<compile_context>
chip_gen: v6e
topology: v6e:2x2x1
jax: 0.10.0
libtpu: 0.0.40
codegen_flags: <defaults>
</compile_context>

<pallas_src>
import jax
import jax.numpy as jnp
from jax.experimental import pallas as pl
from jax.experimental.pallas import tpu as pltpu


# ----------------------------- kernel ---------------------------------------


def mlp_kernel(x_ref, w1_ref, b1_ref, w2_ref, b2_ref, w3_ref, b3_ref, o_ref):
    # x arrives unpadded f32; cast to the MXU compute dtype in-kernel (cheap
    # VPU op hidden under the MXU).
    x = x_ref[...].astype(w1_ref.dtype)
    # fc1 + ReLU  (bf16 x bf16 -> f32 accumulate; bias/ReLU in f32)
    h = jnp.dot(x, w1_ref[...], preferred_element_type=jnp.float32)
    h = jnp.maximum(h + b1_ref[...], 0.0)
    # fc2 + ReLU
    h = jnp.dot(h.astype(w2_ref.dtype), w2_ref[...],
                preferred_element_type=jnp.float32)
    h = jnp.maximum(h + b2_ref[...], 0.0)
    # fc3 (no activation)
    y = jnp.dot(h.astype(w3_ref.dtype), w3_ref[...],
                preferred_element_type=jnp.float32) + b3_ref[...]
    o_ref[...] = y.astype(o_ref.dtype)


# ----------------------------- helpers --------------------------------------


def _round_up(n, m):
    return ((n + m - 1) // m) * m


def _num_tensorcores():
    """Best-effort TensorCores-per-chip detection (v7x/v4 megacore = 2)."""
    try:
        kind = jax.devices()[0].device_kind.lower()
    except Exception:
        return 1
    return 2 if ("v7" in kind or "7x" in kind or "v4" in kind) else 1


def _choose_tiling(batch, num_cores, cap=1024):
    """Pick (batch_tile, padded_batch).

    Single-TC chips (v5e/v6e): one grid step (up to `cap` rows) -- nothing
    meaningful to pipeline with resident weights, so extra steps are pure
    ~0.35us/step overhead.  2-TC chips (v7x): an even number of steps so the
    "parallel" grid axis shards without a 2:1 core imbalance.
    """
    if num_cores <= 1 or batch <= 8:
        bm = min(cap, _round_up(batch, 8))
        return bm, _round_up(batch, bm)
    steps = pl.cdiv(batch, cap)
    steps = max(2, steps + (steps % 2))  # even, >= 2
    bm = _round_up(pl.cdiv(batch, steps), 8)
    return bm, steps * bm


# ----------------------------- parameter prep (once, at init) ---------------


def prepare_params(params, *, compute_dtype=jnp.bfloat16):
    """Pad hidden/output feature dims to multiples of 128 and cast weights to
    the MXU compute dtype.  Called once; the result is reused on every forward
    so no pad/cast work sits on the per-call path.

    Zero padding is numerically exact: padded hidden columns get 0 weights and
    0 bias, contribute 0 through the matmuls, and ReLU(0) = 0; padded output
    columns are sliced off by the wrapper.
    """
    input_size = params["w1"].shape[0]
    hidden_size = params["w1"].shape[1]
    output_size = params["w3"].shape[1]
    hid_p = _round_up(hidden_size, 128)
    out_p = _round_up(output_size, 128)

    def pad2(a, rows, cols, dtype):
        a = a.astype(dtype)
        pr, pc = rows - a.shape[0], cols - a.shape[1]
        if pr or pc:
            a = jnp.pad(a, ((0, pr), (0, pc)))
        return a

    prepared = {
        "w1": pad2(params["w1"], input_size, hid_p, compute_dtype),  # K unpadded
        "b1": pad2(params["b1"], 1, hid_p, jnp.float32),
        "w2": pad2(params["w2"], hid_p, hid_p, compute_dtype),
        "b2": pad2(params["b2"], 1, hid_p, jnp.float32),
        "w3": pad2(params["w3"], hid_p, out_p, compute_dtype),
        "b3": pad2(params["b3"], 1, out_p, jnp.float32),
    }
    # Materialize now so the pad/cast never re-runs inside the forward.
    prepared = jax.tree_util.tree_map(
        lambda a: jax.block_until_ready(jax.device_put(a)), prepared)
    dims = (input_size, hidden_size, output_size)
    return prepared, dims


# ----------------------------- forward --------------------------------------


def neural_net_forward(x, prepared, dims, *, batch_tile=None):
    """x: (B, input_size) f32.  prepared: output of prepare_params."""
    input_size, hidden_size, output_size = dims
    B = x.shape[0]
    assert x.shape[1] == input_size
    hid_p = prepared["w1"].shape[1]
    out_p = prepared["w3"].shape[1]

    num_cores = _num_tensorcores()
    if batch_tile is None:
        bm, B_p = _choose_tiling(B, num_cores)
    else:
        bm = batch_tile
        B_p = _round_up(B, bm)
    grid = (B_p // bm,)

    # Only the batch dim may need padding (x stays f32, feature dim unpadded).
    if B_p > B:
        x = jnp.pad(x, ((0, B_p - B), (0, 0)))

    # Grid-invariant operands: single-buffer them (halves resident weight VMEM).
    def const_spec(rows, cols):
        return pl.BlockSpec((rows, cols), lambda i: (0, 0),
                            pipeline_mode=pl.Buffered(1))

    # Cost estimate from the real (unpadded) problem size.
    flops = 2 * B * (input_size * hidden_size
                     + hidden_size * hidden_size
                     + hidden_size * output_size)
    bytes_accessed = (
        B * input_size * 4                                   # x (f32)
        + (input_size * hidden_size + hidden_size * hidden_size
           + hidden_size * output_size) * 2                  # weights (bf16)
        + (2 * hidden_size + output_size) * 4                # biases (f32)
        + B * output_size * 4)                               # output (f32)

    out = pl.pallas_call(
        mlp_kernel,
        out_shape=jax.ShapeDtypeStruct((B_p, out_p), jnp.float32),
        grid_spec=pltpu.PrefetchScalarGridSpec(
            num_scalar_prefetch=0,
            grid=grid,
            in_specs=[
                pl.BlockSpec((bm, input_size), lambda i: (i, 0)),  # x (pipelined)
                const_spec(input_size, hid_p),                     # w1
                const_spec(1, hid_p),                              # b1
                const_spec(hid_p, hid_p),                          # w2
                const_spec(1, hid_p),                              # b2
                const_spec(hid_p, out_p),                          # w3
                const_spec(1, out_p),                              # b3
            ],
            out_specs=pl.BlockSpec((bm, out_p), lambda i: (i, 0)),
        ),
        compiler_params=pltpu.CompilerParams(
            dimension_semantics=("parallel",)),
        cost_estimate=pl.CostEstimate(flops=flops, transcendentals=0,
                                      bytes_accessed=bytes_accessed),
    )(x, prepared["w1"], prepared["b1"], prepared["w2"], prepared["b2"],
      prepared["w3"], prepared["b3"])

    # Padded rows / output columns are dropped here.  (Consumers that tolerate
    # the padded slab can skip this slice to save an HBM pass.)
    return out[:B, :output_size]


# ----------------------------- init & references ----------------------------


def init_params(key, input_size, hidden_size, output_size):
    """Deterministic init mimicking nn.Linear's uniform(-1/sqrt(fan_in), ...)."""
    ks = jax.random.split(key, 6)

    def linear(kw, kb, fan_in, fan_out):
        bound = 1.0 / jnp.sqrt(fan_in)
        # stored as (in, out) == PyTorch weight (out, in) transposed
        w = jax.random.uniform(kw, (fan_in, fan_out), jnp.float32, -bound, bound)
        b = jax.random.uniform(kb, (1, fan_out), jnp.float32, -bound, bound)
        return w, b

    w1, b1 = linear(ks[0], ks[1], input_size, hidden_size)
    w2, b2 = linear(ks[2], ks[3], hidden_size, hidden_size)
    w3, b3 = linear(ks[4], ks[5], hidden_size, output_size)
    return {"w1": w1, "b1": b1, "w2": w2, "b2": b2, "w3": w3, "b3": b3}


def reference_forward_f32(x, p):
    h = jnp.maximum(x @ p["w1"] + p["b1"], 0.0)
    h = jnp.maximum(h @ p["w2"] + p["b2"], 0.0)
    return h @ p["w3"] + p["b3"]


def reference_forward_matched(x, p, compute_dtype):
    """Same rounding points as the kernel: bf16 matmul inputs, f32 accum/bias/ReLU."""
    up = lambda a: a.astype(compute_dtype).astype(jnp.float32)
    h = jnp.maximum(jnp.dot(up(x), up(p["w1"])) + p["b1"], 0.0)
    h = jnp.maximum(jnp.dot(up(h), up(p["w2"])) + p["b2"], 0.0)
    return jnp.dot(up(h), up(p["w3"])) + p["b3"]


if __name__ == "__main__":
    input_size, hidden_size, output_size = 32, 64, 16
    batch = 64  # 1 grid step on v5e/v6e; 2 balanced steps on v7x

    key = jax.random.PRNGKey(0)
    kx, kp = jax.random.split(key)
    x = jax.random.normal(kx, (batch, input_size), jnp.float32)
    params = init_params(kp, input_size, hidden_size, output_size)

    prepared, dims = prepare_params(params)          # once, at init
    out = neural_net_forward(x, prepared, dims)      # per-call path
    out = jax.block_until_ready(out)
    assert out.shape == (batch, output_size)

    ref_matched = reference_forward_matched(x, params, jnp.bfloat16)
    assert jnp.allclose(out, ref_matched, atol=1e-2, rtol=1e-2), \
        float(jnp.max(jnp.abs(out - ref_matched)))
    ref_f32 = reference_forward_f32(x, params)
    assert jnp.allclose(out, ref_f32, atol=5e-2, rtol=5e-2), \
        float(jnp.max(jnp.abs(out - ref_f32)))

    print("KERNEL_OK")
</pallas_src>

<mosaic_0001>
module attributes {stable_mosaic.version = 11 : i64} {
  func.func @mlp_kernel(%arg0: i32, %arg1: memref<64x32xf32, #tpu.memory_space<vmem>>, %arg2: memref<32x128xbf16, #tpu.memory_space<vmem>>, %arg3: memref<1x128xf32, #tpu.memory_space<vmem>>, %arg4: memref<128x128xbf16, #tpu.memory_space<vmem>>, %arg5: memref<1x128xf32, #tpu.memory_space<vmem>>, %arg6: memref<128x128xbf16, #tpu.memory_space<vmem>>, %arg7: memref<1x128xf32, #tpu.memory_space<vmem>>, %arg8: memref<64x128xf32, #tpu.memory_space<vmem>>) attributes {dimension_semantics = [#tpu.dimension_semantics<parallel>], iteration_bounds = array<i64: 1>, scalar_prefetch = 0 : i64, scratch_operands = 0 : i64, tpu.core_type = #tpu.core_type<tc>, window_params = [{transform_indices = @transform_0, window_bounds = array<i64: 64, 32>}, {pipeline_mode = #tpu.pipeline_mode<synchronous>, transform_indices = @transform_1, window_bounds = array<i64: 32, 128>}, {pipeline_mode = #tpu.pipeline_mode<synchronous>, transform_indices = @transform_2, window_bounds = array<i64: 1, 128>}, {pipeline_mode = #tpu.pipeline_mode<synchronous>, transform_indices = @transform_3, window_bounds = array<i64: 128, 128>}, {pipeline_mode = #tpu.pipeline_mode<synchronous>, transform_indices = @transform_4, window_bounds = array<i64: 1, 128>}, {pipeline_mode = #tpu.pipeline_mode<synchronous>, transform_indices = @transform_5, window_bounds = array<i64: 128, 128>}, {pipeline_mode = #tpu.pipeline_mode<synchronous>, transform_indices = @transform_6, window_bounds = array<i64: 1, 128>}, {transform_indices = @transform_7, window_bounds = array<i64: 64, 128>}]} {
    %c0 = arith.constant 0 : index
    %c0_0 = arith.constant 0 : index
    %0 = vector.load %arg1[%c0, %c0_0] : memref<64x32xf32, #tpu.memory_space<vmem>>, vector<64x32xf32>
    %1 = arith.truncf %0 : vector<64x32xf32> to vector<64x32xbf16>
    %c0_1 = arith.constant 0 : index
    %c0_2 = arith.constant 0 : index
    %2 = vector.load %arg2[%c0_1, %c0_2] : memref<32x128xbf16, #tpu.memory_space<vmem>>, vector<32x128xbf16>
    %cst = arith.constant dense<0.000000e+00> : vector<64x128xf32>
    %3 = tpu.matmul %1, %2, %cst {dimension_numbers = #tpu.dot_dimension_numbers<[1], [0], [0], [1], [0, 0, 1, 1], [], []>} : vector<64x32xbf16>, vector<32x128xbf16>, vector<64x128xf32> -> vector<64x128xf32>
    %c0_3 = arith.constant 0 : index
    %c0_4 = arith.constant 0 : index
    %4 = vector.load %arg3[%c0_3, %c0_4] : memref<1x128xf32, #tpu.memory_space<vmem>>, vector<1x128xf32>
    %5 = vector.broadcast %4 : vector<1x128xf32> to vector<64x128xf32>
    %6 = arith.addf %3, %5 : vector<64x128xf32>
    %cst_5 = arith.constant 0.000000e+00 : f32
    %7 = vector.broadcast %cst_5 : f32 to vector<64x128xf32>
    %8 = arith.maximumf %6, %7 : vector<64x128xf32>
    %9 = arith.truncf %8 : vector<64x128xf32> to vector<64x128xbf16>
    %c0_6 = arith.constant 0 : index
    %c0_7 = arith.constant 0 : index
    %10 = vector.load %arg4[%c0_6, %c0_7] : memref<128x128xbf16, #tpu.memory_space<vmem>>, vector<128x128xbf16>
    %cst_8 = arith.constant dense<0.000000e+00> : vector<64x128xf32>
    %11 = tpu.matmul %9, %10, %cst_8 {dimension_numbers = #tpu.dot_dimension_numbers<[1], [0], [0], [1], [0, 0, 1, 1], [], []>} : vector<64x128xbf16>, vector<128x128xbf16>, vector<64x128xf32> -> vector<64x128xf32>
    %c0_9 = arith.constant 0 : index
    %c0_10 = arith.constant 0 : index
    %12 = vector.load %arg5[%c0_9, %c0_10] : memref<1x128xf32, #tpu.memory_space<vmem>>, vector<1x128xf32>
    %13 = vector.broadcast %12 : vector<1x128xf32> to vector<64x128xf32>
    %14 = arith.addf %11, %13 : vector<64x128xf32>
    %cst_11 = arith.constant 0.000000e+00 : f32
    %15 = vector.broadcast %cst_11 : f32 to vector<64x128xf32>
    %16 = arith.maximumf %14, %15 : vector<64x128xf32>
    %17 = arith.truncf %16 : vector<64x128xf32> to vector<64x128xbf16>
    %c0_12 = arith.constant 0 : index
    %c0_13 = arith.constant 0 : index
    %18 = vector.load %arg6[%c0_12, %c0_13] : memref<128x128xbf16, #tpu.memory_space<vmem>>, vector<128x128xbf16>
    %cst_14 = arith.constant dense<0.000000e+00> : vector<64x128xf32>
    %19 = tpu.matmul %17, %18, %cst_14 {dimension_numbers = #tpu.dot_dimension_numbers<[1], [0], [0], [1], [0, 0, 1, 1], [], []>} : vector<64x128xbf16>, vector<128x128xbf16>, vector<64x128xf32> -> vector<64x128xf32>
    %c0_15 = arith.constant 0 : index
    %c0_16 = arith.constant 0 : index
    %20 = vector.load %arg7[%c0_15, %c0_16] : memref<1x128xf32, #tpu.memory_space<vmem>>, vector<1x128xf32>
    %21 = vector.broadcast %20 : vector<1x128xf32> to vector<64x128xf32>
    %22 = arith.addf %19, %21 : vector<64x128xf32>
    %c0_17 = arith.constant 0 : index
    %c0_18 = arith.constant 0 : index
    %23 = vector.load %arg8[%c0_17, %c0_18] : memref<64x128xf32, #tpu.memory_space<vmem>>, vector<64x128xf32>
    tpu.vector_store %arg8[%c0_17, %c0_18], %22 {strides = array<i32>} : memref<64x128xf32, #tpu.memory_space<vmem>>, vector<64x128xf32>,
    return
  }
  func.func @transform_0(%arg0: i32) -> (i32, i32) {
    %c0_i32 = arith.constant 0 : i32
    %c0_i32_0 = arith.constant 0 : i32
    return %arg0, %c0_i32 : i32, i32
  }
  func.func @transform_1(%arg0: i32) -> (i32, i32) {
    %c0_i32 = arith.constant 0 : i32
    %c0_i32_0 = arith.constant 0 : i32
    %c0_i32_1 = arith.constant 0 : i32
    return %c0_i32, %c0_i32_0 : i32, i32
  }
  func.func @transform_2(%arg0: i32) -> (i32, i32) {
    %c0_i32 = arith.constant 0 : i32
    %c0_i32_0 = arith.constant 0 : i32
    %c0_i32_1 = arith.constant 0 : i32
    return %c0_i32, %c0_i32_0 : i32, i32
  }
  func.func @transform_3(%arg0: i32) -> (i32, i32) {
    %c0_i32 = arith.constant 0 : i32
    %c0_i32_0 = arith.constant 0 : i32
    %c0_i32_1 = arith.constant 0 : i32
    return %c0_i32, %c0_i32_0 : i32, i32
  }
  func.func @transform_4(%arg0: i32) -> (i32, i32) {
    %c0_i32 = arith.constant 0 : i32
    %c0_i32_0 = arith.constant 0 : i32
    %c0_i32_1 = arith.constant 0 : i32
    return %c0_i32, %c0_i32_0 : i32, i32
  }
  func.func @transform_5(%arg0: i32) -> (i32, i32) {
    %c0_i32 = arith.constant 0 : i32
    %c0_i32_0 = arith.constant 0 : i32
    %c0_i32_1 = arith.constant 0 : i32
    return %c0_i32, %c0_i32_0 : i32, i32
  }
  func.func @transform_6(%arg0: i32) -> (i32, i32) {
    %c0_i32 = arith.constant 0 : i32
    %c0_i32_0 = arith.constant 0 : i32
    %c0_i32_1 = arith.constant 0 : i32
    return %c0_i32, %c0_i32_0 : i32, i32
  }
  func.func @transform_7(%arg0: i32) -> (i32, i32) {
    %c0_i32 = arith.constant 0 : i32
    %c0_i32_0 = arith.constant 0 : i32
    return %arg0, %c0_i32 : i32, i32
  }
}

</mosaic_0001>

<bundles_post_ra>
// kernel: tpu_custom_call.1
= control target key start
LH: loop header
LB: loop body
LE: loop exit
PB: predicated region body
PF: predicated region fallthrough
CT: control target
= control target key end

     0   :  { %12 = vsyncpa [#allocation3], 0  ;;  %s778_s0 = inlined_call_operand.vmem [shape: f32[64,32], index: 0, kind: input, shape index: {}]   ;;  %s779_s1 = inlined_call_operand.vmem [shape: bf16[32,128], index: 1, kind: input, shape index: {}]   ;;  %s780_s2 = inlined_call_operand.vmem [shape: f32[1,128], index: 2, kind: input, shape index: {}]   ;;  %s781_s3 = inlined_call_operand.vmem [shape: bf16[128,128], index: 3, kind: input, shape index: {}]   ;;  %s782_s4 = inlined_call_operand.vmem [shape: f32[1,128], index: 4, kind: input, shape index: {}]   ;;  %s783_s5 = inlined_call_operand.hbm [shape: bf16[128,128], index: 5, kind: input, shape index: {}]   ;;  %s784_s6 = inlined_call_operand.vmem [shape: f32[1,128], index: 6, kind: input, shape index: {}]   ;;  %s785_s7 = inlined_call_operand.hbm [shape: f32[64,128], index: 7, kind: output, shape index: {}]  }
   0x1   :  { %13 = vsyncpa [#allocation4], 0  ;;  %s659_s24 = smov [#allocation2]  }
   0x2   :  { %s29_s25 = sshll.u32 %s659_s24, 4  ;;  %s30_s25 = int_to_ptr.vmem [resolvable:$true] %s29_s25 }
   0x3   :  { %s623_s26 = scalar_lea.vmem %s30_s25, 1024  ;;  %p628_p1 = scmp.lt.s32.totalorder %s30_s25, %s30_s25 }
   0x4   :  { %p624_p0 = scmp.ne.s32.totalorder %s30_s25, %s623_s26  ;;  %p629_p2 = scmp.lt.s32.totalorder %s623_s26, %s623_s26 }
   0x6   :  { %p630_p3 = por %p629_p2, %p628_p1 }
   0x8   :  { %p631_p4 = pnand %p630_p3, %p624_p0 }
   0xa   :  { %634 = shalt.err (!%p631_p4)
}
   0xb   :  { %s660_s27 = smov 64   ;;  %s661_s28 = smov 4  }
   0xc   :  { %35 = dma.hbm_to_vmem [thread:$0]  %s783_s5, 1024, %s30_s25, [#allocation3], %s660_s27, %s660_s27, %s661_s28  }
   0xd   :  { %655 = dma.done.wait [#allocation3], 1024  }
   0xe   :  { %656 = vsyncadd [#allocation3], 4294966272  ;;  %v597_v0 = vld [vmem:[%s779_s1 + $0x8] sm:$0xff]   ;;  %v598_v1 = vld [vmem:[%s779_s1] sm:$0xff]   ;;  %vm77_vm0 = vcmask 261120   ;;  %s662_s19 = smov [#allocation5]  }
   0xf   :  { %531 = vmatprep.subr.bf16.mxu0 %v597_v0  ;;  %v42_v2 = vld [vmem:[%s778_s0] sm:$0xff]  ;;  %v43_v3 = vld [vmem:[%s778_s0 + $0x8] sm:$0xff]  ;;  %v44_v5 = vld [vmem:[%s778_s0 + $0x10] sm:$0xff]  ;;  %s464_s20 = sshll.u32 %s662_s19, 4  ;;  %s465_s20 = int_to_ptr.vmem [resolvable:$true] %s464_s20 }
  0x10   :  { %532 = vmatpush3.bf16.msra.mxu0 %v597_v0  ;;  %v50_v4 = vpack.c.bf16 %v43_v3, %v42_v2  ;;  %v45_v6 = vld [vmem:[%s778_s0 + $0x18] sm:$0xff]  ;;  %v46_v7 = vld [vmem:[%s778_s0 + $0x20] sm:$0xff]  ;;  %v47_v8 = vld [vmem:[%s778_s0 + $0x28] sm:$0xff]  ;;  %p640_p6 = scmp.lt.s32.totalorder %s465_s20, %s465_s20 }
  0x11   :  { %533 = vmatprep.subr.bf16.mxu0 %v598_v1  ;;  %v599_v9 = vld [vmem:[%s781_s3 + $0x38] sm:$0xff]   ;;  %v51_v10 = vpack.c.bf16 %v45_v6, %v44_v5  ;;  %v600_v11 = vld [vmem:[%s781_s3 + $0x30] sm:$0xff]   ;;  %v52_v12 = vpack.c.bf16 %v47_v8, %v46_v7  ;;  %v601_v15 = vld [vmem:[%s781_s3 + $0x28] sm:$0xff]  }
  0x12   :  { %535 = vmatprep.mubr.msk.bf16.mxu0 %vm77_vm0, %v50_v4  ;;  %543 = vmatprep.subr.bf16.mxu1 %v599_v9  ;;  %v48_v13 = vld [vmem:[%s778_s0 + $0x30] sm:$0xff]  ;;  %v49_v14 = vld [vmem:[%s778_s0 + $0x38] sm:$0xff]  ;;  %v602_v16 = vld [vmem:[%s781_s3 + $0x20] sm:$0xff]  }
  0x13   :  { %544 = vmatpush3.bf16.msra.mxu1 %v599_v9  ;;  %v53_v17 = vpack.c.bf16 %v49_v14, %v48_v13  ;;  %v603_v18 = vld [vmem:[%s781_s3 + $0x18] sm:$0xff]   ;;  %v604_v19 = vld [vmem:[%s781_s3 + $0x10] sm:$0xff]   ;;  %v605_v20 = vld [vmem:[%s781_s3 + $0x8] sm:$0xff]  }
  0x14   :  { %534 = vmatpush3.bf16.msra.mxu0 %v598_v1  ;;  %545 = vmatprep.subr.bf16.mxu1 %v600_v11  ;;  %v606_v21 = vld [vmem:[%s781_s3] sm:$0xff]   ;;  %v607_v22 = vld [vmem:[#allocation2 + $0x38] sm:$0xff]   ;;  %v608_v23 = vld [vmem:[#allocation2 + $0x30] sm:$0xff]  }
  0x15   :  { %567 = vmatprep.subr.bf16.mxu0 %v607_v22  ;;  %v609_v24 = vld [vmem:[#allocation2 + $0x28] sm:$0xff]   ;;  %v610_v25 = vld [vmem:[#allocation2 + $0x20] sm:$0xff]   ;;  %v611_v26 = vld [vmem:[#allocation2 + $0x18] sm:$0xff]  }
  0x16   :  { %v476_v29 = vld [vmem:[%s780_s2] ss:$0 sm:$0xff]  ;;  %v612_v56 = vld [vmem:[#allocation2 + $0x10] sm:$0xff]   ;;  %v613_v57 = vld [vmem:[#allocation2 + $0x8] sm:$0xff]  }
  0x17   :  { %536 = vmatmul.mubr.msk.bf16.vlgmr.msra.gmra.mxu0 %vm77_vm0, %v51_v10  ;;  %546 = vmatpush3.bf16.msra.mxu1 %v600_v11  ;;  %v614_v58 = vld [vmem:[#allocation2] sm:$0xff]  }
  0x18   :  { %539 = vmatprep.mubr.msk.bf16.mxu0 %vm77_vm0, %v52_v12  ;;  %547 = vmatprep.subr.bf16.mxu1 %v601_v15  ;;  %v483_v61 = vld [vmem:[%s782_s4] ss:$0 sm:$0xff] }
  0x19   :  { %568 = vmatpush3.bf16.msra.mxu0 %v607_v22 }
  0x1a   :  { %569 = vmatprep.subr.bf16.mxu0 %v608_v23 }
  0x1b   :  { %548 = vmatpush3.bf16.msra.mxu1 %v601_v15 }
  0x1c   :  { %549 = vmatprep.subr.bf16.mxu1 %v602_v16 }
  0x1d   :  { %570 = vmatpush3.bf16.msra.mxu0 %v608_v23 }
  0x1e   :  { %571 = vmatprep.subr.bf16.mxu0 %v609_v24 }
  0x1f   :  { %540 = vmatmul.mubr.msk.bf16.gmra.mxu0 %vm77_vm0, %v53_v17  ;;  %550 = vmatpush3.bf16.msra.mxu1 %v602_v16 }
  0x20   :  { %551 = vmatprep.subr.bf16.mxu1 %v603_v18 }
  0x21   :  { %572 = vmatpush3.bf16.msra.mxu0 %v609_v24  ;;  %v492_v24 = vld [vmem:[%s784_s6] ss:$0 sm:$0xff]  ;;  %s635_s6 = scalar_lea.vmem %s465_s20, 1024 }
  0x22   :  { %573 = vmatprep.subr.bf16.mxu0 %v610_v25  ;;  %p636_p5 = scmp.ne.s32.totalorder %s465_s20, %s635_s6  ;;  %p641_p7 = scmp.lt.s32.totalorder %s635_s6, %s635_s6 }
  0x23   :  { %552 = vmatpush3.bf16.msra.mxu1 %v603_v18 }
  0x24   :  { %553 = vmatprep.subr.bf16.mxu1 %v604_v19  ;;  %p642_p8 = por %p641_p7, %p640_p6 }
  0x25   :  { %574 = vmatpush3.bf16.msra.mxu0 %v610_v25 }
  0x26   :  { %575 = vmatprep.subr.bf16.mxu0 %v611_v26  ;;  %p643_p9 = pnand %p642_p8, %p636_p5 }
  0x27   :  { %554 = vmatpush3.bf16.msra.mxu1 %v604_v19 }
  0x28   :  { %555 = vmatprep.subr.bf16.mxu1 %v605_v20 }
  0x29   :  { %576 = vmatpush3.bf16.msra.mxu0 %v611_v26 }
  0x2a   :  { %577 = vmatprep.subr.bf16.mxu0 %v612_v56 }
  0x2b   :  { %556 = vmatpush3.bf16.msra.mxu1 %v605_v20 }
  0x2c   :  { %557 = vmatprep.subr.bf16.mxu1 %v606_v21 }
  0x2d   :  { %578 = vmatpush3.bf16.msra.mxu0 %v612_v56 }
  0x2e   :  { %579 = vmatprep.subr.bf16.mxu0 %v613_v57 }
  0x2f   :  { %558 = vmatpush3.bf16.msra.mxu1 %v606_v21 }
  0x31   :  { %580 = vmatpush3.bf16.msra.mxu0 %v613_v57 }
  0x32   :  { %581 = vmatprep.subr.bf16.mxu0 %v614_v58 }
  0x35   :  { %582 = vmatpush3.bf16.msra.mxu0 %v614_v58 }
  0xd7   :  { %v537_v27 = vpop.f32.mrf.mxu0 }
  0xd8   :  { %v133_v33 = vadd.f32 %v537_v27, %v476_v29 }
  0xd9   :  { %v124_v28 = vpop.f32.mrf.mxu0 }
  0xda   :  { %v125_v31 = vadd.f32 %v476_v29, %v124_v28  ;;  %v157_v40 = vmax.f32 %v133_v33, 0.0 }
  0xdb   :  { %v538_v30 = vpop.f32.mrf.mxu0 }
  0xdc   :  { %v136_v32 = vadd.f32 %v538_v30, %v476_v29  ;;  %v155_v38 = vmax.f32 %v125_v31, 0.0 }
  0xdd   :  { %v127_v34 = vpop.f32.mrf.mxu0 }
  0xde   :  { %v128_v35 = vadd.f32 %v476_v29, %v127_v34  ;;  %v158_v36 = vmax.f32 %v136_v32, 0.0 }
  0xdf   :  { %v541_v37 = vpop.f32.mrf.mxu0 }
  0xe0   :  { %v156_v39 = vmax.f32 %v128_v35, 0.0  ;;  %v164_v43 = vpack.c.bf16 %v158_v36, %v157_v40  ;;  %v149_v47 = vadd.f32 %v541_v37, %v476_v29 }
  0xe1   :  { %v140_v41 = vpop.f32.mrf.mxu0 }
  0xe2   :  { %v163_v42 = vpack.c.bf16 %v156_v39, %v155_v38  ;;  %v141_v45 = vadd.f32 %v476_v29, %v140_v41  ;;  %v161_v53 = vmax.f32 %v149_v47, 0.0 }
  0xe3   :  { %v542_v44 = vpop.f32.mrf.mxu0 }
  0xe4   :  { %v152_v46 = vadd.f32 %v542_v44, %v476_v29  ;;  %559 = vmatprep.mubr.bf16.mxu1 %v163_v42  ;;  %v159_v51 = vmax.f32 %v141_v45, 0.0 }
  0xe5   :  { %v143_v48 = vpop.f32.mrf.mxu0  ;;  %560 = vmatmul.mubr.bf16.vlgmr.msra.gmra.mxu1 %v164_v43 }
  0xe6   :  { %v144_v49 = vadd.f32 %v476_v29, %v143_v48  ;;  %v162_v50 = vmax.f32 %v152_v46, 0.0 }
  0xe8   :  { %v160_v52 = vmax.f32 %v144_v49, 0.0  ;;  %v166_v55 = vpack.c.bf16 %v162_v50, %v161_v53 }
  0xea   :  { %v165_v54 = vpack.c.bf16 %v160_v52, %v159_v51 }
  0xec   :  { %563 = vmatprep.mubr.bf16.mxu1 %v165_v54 }
  0xed   :  { %564 = vmatmul.mubr.bf16.gmra.mxu1 %v166_v55 }
 0x1a5   :  { %v561_v59 = vpop.f32.mrf.mxu1 }
 0x1a6   :  { %v281_v1 = vadd.f32 %v561_v59, %v483_v61 }
 0x1a7   :  { %v272_v60 = vpop.f32.mrf.mxu1 }
 0x1a8   :  { %v273_v63 = vadd.f32 %v483_v61, %v272_v60  ;;  %v305_v8 = vmax.f32 %v281_v1, 0.0 }
 0x1a9   :  { %v562_v62 = vpop.f32.mrf.mxu1 }
 0x1aa   :  { %v284_v0 = vadd.f32 %v562_v62, %v483_v61  ;;  %v303_v6 = vmax.f32 %v273_v63, 0.0 }
 0x1ab   :  { %v275_v2 = vpop.f32.mrf.mxu1 }
 0x1ac   :  { %v276_v3 = vadd.f32 %v483_v61, %v275_v2  ;;  %v306_v4 = vmax.f32 %v284_v0, 0.0 }
 0x1ad   :  { %v565_v5 = vpop.f32.mrf.mxu1 }
 0x1ae   :  { %v304_v7 = vmax.f32 %v276_v3, 0.0  ;;  %v312_v11 = vpack.c.bf16 %v306_v4, %v305_v8  ;;  %v297_v15 = vadd.f32 %v565_v5, %v483_v61 }
 0x1af   :  { %v288_v9 = vpop.f32.mrf.mxu1 }
 0x1b0   :  { %v311_v10 = vpack.c.bf16 %v304_v7, %v303_v6  ;;  %v289_v13 = vadd.f32 %v483_v61, %v288_v9  ;;  %v309_v21 = vmax.f32 %v297_v15, 0.0 }
 0x1b1   :  { %v566_v12 = vpop.f32.mrf.mxu1 }
 0x1b2   :  { %v300_v14 = vadd.f32 %v566_v12, %v483_v61  ;;  %583 = vmatprep.mubr.bf16.mxu0 %v311_v10  ;;  %v307_v19 = vmax.f32 %v289_v13, 0.0 }
 0x1b3   :  { %v291_v16 = vpop.f32.mrf.mxu1  ;;  %584 = vmatmul.mubr.bf16.vlgmr.msra.gmra.mxu0 %v312_v11 }
 0x1b4   :  { %v292_v17 = vadd.f32 %v483_v61, %v291_v16  ;;  %v310_v18 = vmax.f32 %v300_v14, 0.0 }
 0x1b6   :  { %v308_v20 = vmax.f32 %v292_v17, 0.0  ;;  %v314_v23 = vpack.c.bf16 %v310_v18, %v309_v21 }
 0x1b8   :  { %v313_v22 = vpack.c.bf16 %v308_v20, %v307_v19 }
 0x1ba   :  { %587 = vmatprep.mubr.bf16.mxu0 %v313_v22 }
 0x1bb   :  { %588 = vmatmul.mubr.bf16.gmra.mxu0 %v314_v23 }
 0x273   :  { %v585_v25 = vpop.f32.mrf.mxu0 }
 0x274   :  { %v429_v26 = vadd.f32 %v585_v25, %v492_v24 }
 0x275   :  { %v420_v27 = vpop.f32.mrf.mxu0 }
 0x276   :  { %453 = vst [vmem:[#allocation5 + $0x10] sm:$0xff] %v429_v26  ;;  %v421_v28 = vadd.f32 %v492_v24, %v420_v27 }
 0x277   :  { %v586_v29 = vpop.f32.mrf.mxu0 }
 0x278   :  { %451 = vst [vmem:[#allocation5] sm:$0xff] %v421_v28  ;;  %v432_v30 = vadd.f32 %v586_v29, %v492_v24 }
 0x279   :  { %v423_v31 = vpop.f32.mrf.mxu0 }
 0x27a   :  { %454 = vst [vmem:[#allocation5 + $0x18] sm:$0xff] %v432_v30  ;;  %v424_v32 = vadd.f32 %v492_v24, %v423_v31 }
 0x27b   :  { %v589_v33 = vpop.f32.mrf.mxu0 }
 0x27c   :  { %452 = vst [vmem:[#allocation5 + $0x8] sm:$0xff] %v424_v32  ;;  %v445_v34 = vadd.f32 %v589_v33, %v492_v24 }
 0x27d   :  { %v436_v35 = vpop.f32.mrf.mxu0 }
 0x27e   :  { %457 = vst [vmem:[#allocation5 + $0x30] sm:$0xff] %v445_v34  ;;  %v437_v36 = vadd.f32 %v492_v24, %v436_v35 }
 0x27f   :  { %v590_v37 = vpop.f32.mrf.mxu0 }
 0x280   :  { %455 = vst [vmem:[#allocation5 + $0x20] sm:$0xff] %v437_v36  ;;  %v448_v38 = vadd.f32 %v590_v37, %v492_v24 }
 0x281   :  { %v439_v39 = vpop.f32.mrf.mxu0 }
 0x282   :  { %458 = vst [vmem:[#allocation5 + $0x38] sm:$0xff] %v448_v38  ;;  %v440_v40 = vadd.f32 %v492_v24, %v439_v39 }
 0x284   :  { %456 = vst [vmem:[#allocation5 + $0x28] sm:$0xff] %v440_v40 }
 0x285   :  { %646 = shalt.err (!%p643_p9)
}
 0x286   :  { %s663_s21 = smov 128   ;;  %s664_s22 = smov 8  }
 0x287   :  { %470 = dma.vmem_to_hbm [thread:$0]  %s465_s20, 1024, %s785_s7, [#allocation4], %s663_s21, %s663_s21, %s664_s22  }
 0x288   :  { %657 = dma.done.wait [#allocation4], 1024  }
 0x289   :  { %658 = vsyncadd [#allocation4], 4294966272 }
 0x28a   :  { %474 = vsyncpa [#allocation3], 1 }
 0x28b   :  { %475 = vsyncpa [#allocation4], 1 }

</bundles_post_ra>
